<compile_context>
chip_gen: v7x
topology: tpu7x:2x2x1
jax: 0.10.0
libtpu: 0.0.40
codegen_flags: <defaults>
</compile_context>

<pallas_src>
import math
import functools

import jax
import jax.numpy as jnp
from jax.experimental import pallas as pl
from jax.experimental.pallas import tpu as pltpu

_NUM_CONVS = 3  # num_layers=3 -> 2 masked head convs + 1 cls conv


# ---------------------------------------------------------------------------
# Kernel
# ---------------------------------------------------------------------------
def _cls_head_kernel(x_ref, m_ref,
                     w1_ref, b1_ref, w2_ref, b2_ref, wc_ref, bc_ref,
                     out_ref, *, K, Ttile):
    """One (level*batch, time-tile) grid step.

    x_ref : [Cin, Tp]  halo-padded full time axis, VMEM-resident, revisited
                       across the time-tile axis (its index map ignores t).
    m_ref : [1,  Tp]   0/1 mask with the same halo padding.
    w*_ref: [K, Cout, Cin] bf16 per-tap weights (whole-array VMEM resident).
    b*_ref: [Cout, 1]  f32 biases.
    out_ref:[NC, Ttile] lane-dense f32 output tile.
    """
    pad = K // 2
    H = _NUM_CONVS * pad                      # receptive-field halo radius
    win = Ttile + 2 * H
    t0 = pl.multiple_of(pl.program_id(1) * Ttile, Ttile)

    # Mask window loaded ONCE per tile; per-layer masks are static slices.
    mw = m_ref[:, pl.ds(t0, win)]             # [1, Ttile + 2H]
    m_out = mw[:, H:H + Ttile]

    # Fully-masked tiles (pure level / length padding) skip all MXU work.
    tile_valid = jnp.max(m_out) > 0.0

    @pl.when(tile_valid)
    def _compute():
        # One aligned dynamic-window load; tap operands are static slices of
        # it, so halo columns come from the resident full-T input (exact at
        # interior tile edges, zero-padded at the sequence ends).
        xw = x_ref[:, pl.ds(t0, win)].astype(jnp.bfloat16)   # [Cin, win]

        def tap_conv(w_ref, src, width):
            acc = jnp.dot(w_ref[0], src[:, 0:width],
                          preferred_element_type=jnp.float32)
            for k in range(1, K):
                acc += jnp.dot(w_ref[k], src[:, k:k + width],
                               preferred_element_type=jnp.float32)
            return acc

        # ---- MaskedConv1D #1 (+ Identity norm + ReLU) --------------------
        wid1 = Ttile + 2 * (H - pad)
        h = tap_conv(w1_ref, xw, wid1) + b1_ref[...]
        h = jnp.maximum(h * mw[:, pad:pad + wid1], 0.0).astype(jnp.bfloat16)

        # ---- MaskedConv1D #2 (+ Identity norm + ReLU) --------------------
        wid2 = Ttile + 2 * (H - 2 * pad)
        g = tap_conv(w2_ref, h, wid2) + b2_ref[...]
        g = jnp.maximum(g * mw[:, 2 * pad:2 * pad + wid2],
                        0.0).astype(jnp.bfloat16)

        # ---- cls conv: shift on the OUTPUT side (NC rows << feat rows) ----
        z = [jnp.dot(wc_ref[k], g, preferred_element_type=jnp.float32)
             for k in range(K)]                               # K x [NC, wid2]
        y = z[0][:, 0:Ttile]
        for k in range(1, K):
            y = y + z[k][:, k:k + Ttile]
        out_ref[...] = ((y + bc_ref[...]) * m_out).astype(out_ref.dtype)

    @pl.when(jnp.logical_not(tile_valid))
    def _zero():
        out_ref[...] = jnp.zeros_like(out_ref)


# ---------------------------------------------------------------------------
# Fused pallas_call (all levels, all batch elements, all time tiles)
# ---------------------------------------------------------------------------
def _run_fused(feat_all, mask_all, params, K, Tmax, Ttile):
    LB, Cin, Tp = feat_all.shape
    F = params["b1"].shape[0]
    NC = params["bc"].shape[0]
    pad = K // 2
    H = _NUM_CONVS * pad
    assert Tp == Tmax + 2 * H and Tmax % Ttile == 0
    nT = Tmax // Ttile

    kernel = functools.partial(_cls_head_kernel, K=K, Ttile=Ttile)
    # Whole-array VMEM residency for weights/biases (constant index map =>
    # pointless to route them through the double-buffered pipeline).
    wspec = pl.BlockSpec(memory_space=pltpu.MemorySpace.VMEM)

    # Rough per-step VMEM footprint; only raise the scoped limit if needed.
    win = Ttile + 2 * H
    wbytes = sum(int(params[k].size) * params[k].dtype.itemsize
                 for k in ("w1", "b1", "w2", "b2", "wc", "bc"))
    est = (2 * Cin * Tp * feat_all.dtype.itemsize     # revisited feat block
           + 2 * 1 * Tp * 4                           # mask block
           + 2 * NC * Ttile * 4                       # output block
           + wbytes
           + Cin * win * 2                            # xw (bf16)
           + 2 * F * win * (2 + 4)                    # h/g bf16 + f32 accs
           + (K + 1) * NC * win * 4)                  # z_k + y
    vmem_limit = None
    if est > 12 * 1024 * 1024:
        vmem_limit = min(int(est * 3 // 2), 64 * 1024 * 1024)

    flops = 2 * K * LB * Tmax * (Cin * F + F * F + F * NC)
    bytes_accessed = (int(feat_all.size) * feat_all.dtype.itemsize
                      + int(mask_all.size) * 4 + LB * NC * Tmax * 4 + wbytes)

    return pl.pallas_call(
        kernel,
        out_shape=jax.ShapeDtypeStruct((LB, NC, Tmax), jnp.float32),
        grid=(LB, nT),
        in_specs=[
            # feat / mask: full halo-padded T per (level,batch) row; the index
            # map ignores t, so each row is DMA'd once and revisited across
            # the inner (fastest) time-tile axis.
            pl.BlockSpec((None, Cin, Tp), lambda lb, t: (lb, 0, 0)),
            pl.BlockSpec((None, 1, Tp), lambda lb, t: (lb, 0, 0)),
            wspec, wspec, wspec, wspec, wspec, wspec,
        ],
        out_specs=pl.BlockSpec((None, NC, Ttile), lambda lb, t: (lb, 0, t)),
        compiler_params=pltpu.CompilerParams(
            dimension_semantics=("parallel", "parallel"),
            vmem_limit_bytes=vmem_limit),
        cost_estimate=pl.CostEstimate(flops=flops, transcendentals=0,
                                      bytes_accessed=bytes_accessed),
    )(feat_all, mask_all, params["w1"], params["b1"], params["w2"],
      params["b2"], params["wc"], params["bc"])


def pt_transformer_cls_head_forward(fpn_feats, fpn_masks, params,
                                    kernel_size=3, t_tile=128):
    """fpn_feats: list of [B, C, T_l]; fpn_masks: list of [B, T_l] (bool/float).
    Returns a tuple of logits, each [B, num_classes, T_l] (PyTorch layout)."""
    assert len(fpn_feats) == len(fpn_masks)
    B = fpn_feats[0].shape[0]
    pad = kernel_size // 2
    H = _NUM_CONVS * pad
    Ts = [int(f.shape[-1]) for f in fpn_feats]
    Tmax = t_tile * pl.cdiv(max(Ts), t_tile)
    Tp = Tmax + 2 * H

    feats, masks = [], []
    for f, m in zip(fpn_feats, fpn_masks):
        T = f.shape[-1]
        # Zero feature + zero mask padding reproduces the per-level zero
        # same-padding of the conv stack exactly (see reference check below).
        feats.append(jnp.pad(f, ((0, 0), (0, 0), (H, Tp - H - T))))
        masks.append(jnp.pad(m.astype(jnp.float32)[:, None, :],
                             ((0, 0), (0, 0), (H, Tp - H - T))))
    feat_all = jnp.concatenate(feats, axis=0)          # [L*B, C, Tp]
    mask_all = jnp.concatenate(masks, axis=0)          # [L*B, 1, Tp]

    out = _run_fused(feat_all, mask_all, params, kernel_size, Tmax, t_tile)
    return tuple(out[l * B:(l + 1) * B, :, :T] for l, T in enumerate(Ts))


# ---------------------------------------------------------------------------
# Deterministic parameter init (mirrors module __init__ shapes)
# ---------------------------------------------------------------------------
def make_params(key, input_dim, feat_dim, num_classes, kernel_size=3,
                prior_prob=0.01, empty_cls=()):
    K = kernel_size
    k1, k2, k3, k4, k5 = jax.random.split(key, 5)

    def conv_w(k, cin, cout):
        # PyTorch Conv1d weight [out, in, K] -> per-tap [K, out, in], bf16.
        w = 0.02 * jax.random.normal(k, (cout, cin, K), jnp.float32)
        return jnp.transpose(w, (2, 0, 1)).astype(jnp.bfloat16)

    bias_value = -math.log((1.0 - prior_prob) / prior_prob)
    bc = jnp.full((num_classes,), bias_value, jnp.float32)
    if len(empty_cls) > 0:
        empty_val = -math.log((1.0 - 1e-6) / 1e-6)
        bc = bc.at[jnp.array(list(empty_cls))].set(empty_val)
    return {
        "w1": conv_w(k1, input_dim, feat_dim),
        "b1": 0.02 * jax.random.normal(k2, (feat_dim, 1), jnp.float32),
        "w2": conv_w(k3, feat_dim, feat_dim),
        "b2": 0.02 * jax.random.normal(k4, (feat_dim, 1), jnp.float32),
        "wc": conv_w(k5, feat_dim, num_classes),
        "bc": bc.reshape(num_classes, 1),
    }


# ---------------------------------------------------------------------------
# Pure-JAX reference (same bf16-operand / f32-accum numerics), per level
# ---------------------------------------------------------------------------
def _ref_conv(x_bct, w_koc, b_o1, K):
    pad = K // 2
    T = x_bct.shape[-1]
    xp = jnp.pad(x_bct, ((0, 0), (0, 0), (pad, pad))).astype(jnp.bfloat16)
    out = None
    for k in range(K):
        term = jnp.einsum("oc,bct->bot", w_koc[k], xp[:, :, k:k + T],
                          preferred_element_type=jnp.float32)
        out = term if out is None else out + term
    return out + b_o1[None]


def _ref_forward(fpn_feats, fpn_masks, params, K=3):
    outs = tuple()
    for feat, mask in zip(fpn_feats, fpn_masks):
        m = mask.astype(jnp.float32)[:, None, :]
        h = jax.nn.relu(_ref_conv(feat, params["w1"], params["b1"], K) * m)
        h = jax.nn.relu(_ref_conv(h, params["w2"], params["b2"], K) * m)
        lg = _ref_conv(h, params["wc"], params["bc"], K) * m
        outs += (lg,)
    return outs


# ---------------------------------------------------------------------------
if __name__ == "__main__":
    key = jax.random.PRNGKey(0)
    B, input_dim, feat_dim, num_classes, K = 2, 16, 32, 8, 3
    params = make_params(key, input_dim, feat_dim, num_classes, K)

    # Two FPN levels with different temporal lengths (level 0 exercises two
    # time tiles at t_tile=128; level 1 exercises level padding + tile skip).
    k_f1, k_f2 = jax.random.split(jax.random.fold_in(key, 1), 2)
    Ts = (256, 128)
    fpn_feats = [
        jax.random.normal(k_f1, (B, input_dim, Ts[0]), jnp.float32),
        jax.random.normal(k_f2, (B, input_dim, Ts[1]), jnp.float32),
    ]
    # Valid-length masks per level (per batch element).
    lens = [jnp.array([256, 192]), jnp.array([128, 77])]
    fpn_masks = [
        (jnp.arange(T)[None, :] < ln[:, None]) for T, ln in zip(Ts, lens)
    ]

    out = pt_transformer_cls_head_forward(fpn_feats, fpn_masks, params,
                                          kernel_size=K, t_tile=128)
    out = jax.tree_util.tree_map(jax.block_until_ready, out)

    ref = _ref_forward(fpn_feats, fpn_masks, params, K)
    for o, r in zip(out, ref):
        assert o.shape == r.shape and o.dtype == jnp.float32
        err = float(jnp.max(jnp.abs(o - r)))
        assert jnp.allclose(o, r, atol=2e-2, rtol=2e-2), err

    print("KERNEL_OK")
</pallas_src>

<mosaic_0001>
module attributes {stable_mosaic.version = 11 : i64} {
  func.func @_cls_head_kernel(%arg0: i32, %arg1: i32, %arg2: memref<1x16x262xf32, #tpu.memory_space<vmem>>, %arg3: memref<1x1x262xf32, #tpu.memory_space<vmem>>, %arg4: memref<3x32x16xbf16, #tpu.memory_space<vmem>>, %arg5: memref<32x1xf32, #tpu.memory_space<vmem>>, %arg6: memref<3x32x32xbf16, #tpu.memory_space<vmem>>, %arg7: memref<32x1xf32, #tpu.memory_space<vmem>>, %arg8: memref<3x8x32xbf16, #tpu.memory_space<vmem>>, %arg9: memref<8x1xf32, #tpu.memory_space<vmem>>, %arg10: memref<1x8x128xf32, #tpu.memory_space<vmem>>) attributes {dimension_semantics = [#tpu.dimension_semantics<parallel>, #tpu.dimension_semantics<parallel>], iteration_bounds = array<i64: 4, 2>, scalar_prefetch = 0 : i64, scratch_operands = 0 : i64, tpu.core_type = #tpu.core_type<tc>, window_params = [{transform_indices = @transform_0, window_bounds = array<i64: 1, 16, 262>}, {transform_indices = @transform_1, window_bounds = array<i64: 1, 1, 262>}, {pipeline_mode = #tpu.pipeline_mode<synchronous>, transform_indices = @transform_2, window_bounds = array<i64: 3, 32, 16>}, {pipeline_mode = #tpu.pipeline_mode<synchronous>, transform_indices = @transform_3, window_bounds = array<i64: 32, 1>}, {pipeline_mode = #tpu.pipeline_mode<synchronous>, transform_indices = @transform_4, window_bounds = array<i64: 3, 32, 32>}, {pipeline_mode = #tpu.pipeline_mode<synchronous>, transform_indices = @transform_5, window_bounds = array<i64: 32, 1>}, {pipeline_mode = #tpu.pipeline_mode<synchronous>, transform_indices = @transform_6, window_bounds = array<i64: 3, 8, 32>}, {pipeline_mode = #tpu.pipeline_mode<synchronous>, transform_indices = @transform_7, window_bounds = array<i64: 8, 1>}, {transform_indices = @transform_8, window_bounds = array<i64: 1, 8, 128>}]} {
    %c128_i32 = arith.constant 128 : i32
    %0 = arith.muli %arg1, %c128_i32 : i32
    %1 = tpu.assume_multiple %0, 128 : i32
    %c0 = arith.constant 0 : index
    %c0_0 = arith.constant 0 : index
    %2 = arith.index_cast %1 : i32 to index
    %3 = vector.load %arg3[%c0, %c0_0, %2] : memref<1x1x262xf32, #tpu.memory_space<vmem>>, vector<1x1x134xf32>
    %4 = vector.shape_cast %3 : vector<1x1x134xf32> to vector<1x134xf32>
    %5 = vector.extract_strided_slice %4 {offsets = [0, 3], sizes = [1, 128], strides = [1, 1]} : vector<1x134xf32> to vector<1x128xf32>
    %6 = vector.shape_cast %5 : vector<1x128xf32> to vector<1x1x128xf32>
    %cst = arith.constant dense<0xFF800000> : vector<1xf32>
    %7 = vector.multi_reduction <maximumf>, %6, %cst [1, 2] : vector<1x1x128xf32> to vector<1xf32>
    %8 = vector.shape_cast %7 : vector<1xf32> to vector<1x1x1xf32>
    %9 = vector.extract %8[0, 0, 0] : f32 from vector<1x1x1xf32>
    %cst_1 = arith.constant 0.000000e+00 : f32
    %10 = arith.cmpf ogt, %9, %cst_1 : f32
    %11 = arith.extui %10 : i1 to i32
    %c0_i32 = arith.constant 0 : i32
    %12 = arith.cmpi ne, %11, %c0_i32 : i32
    scf.if %12 {
      %c0_3 = arith.constant 0 : index
      %c0_4 = arith.constant 0 : index
      %16 = arith.index_cast %1 : i32 to index
      %17 = vector.load %arg2[%c0_3, %c0_4, %16] : memref<1x16x262xf32, #tpu.memory_space<vmem>>, vector<1x16x134xf32>
      %18 = vector.shape_cast %17 : vector<1x16x134xf32> to vector<16x134xf32>
      %19 = arith.truncf %18 : vector<16x134xf32> to vector<16x134xbf16>
      %c0_5 = arith.constant 0 : index
      %c0_6 = arith.constant 0 : index
      %c0_7 = arith.constant 0 : index
      %20 = vector.load %arg4[%c0_5, %c0_6, %c0_7] : memref<3x32x16xbf16, #tpu.memory_space<vmem>>, vector<1x32x16xbf16>
      %21 = vector.shape_cast %20 : vector<1x32x16xbf16> to vector<32x16xbf16>
      %22 = vector.extract_strided_slice %19 {offsets = [0, 0], sizes = [16, 132], strides = [1, 1]} : vector<16x134xbf16> to vector<16x132xbf16>
      %cst_8 = arith.constant dense<0.000000e+00> : vector<32x132xf32>
      %23 = tpu.matmul %21, %22, %cst_8 {dimension_numbers = #tpu.dot_dimension_numbers<[1], [0], [0], [1], [0, 0, 1, 1], [], []>} : vector<32x16xbf16>, vector<16x132xbf16>, vector<32x132xf32> -> vector<32x132xf32>
      %c1 = arith.constant 1 : index
      %c0_9 = arith.constant 0 : index
      %c0_10 = arith.constant 0 : index
      %24 = vector.load %arg4[%c1, %c0_9, %c0_10] : memref<3x32x16xbf16, #tpu.memory_space<vmem>>, vector<1x32x16xbf16>
      %25 = vector.shape_cast %24 : vector<1x32x16xbf16> to vector<32x16xbf16>
      %26 = vector.extract_strided_slice %19 {offsets = [0, 1], sizes = [16, 132], strides = [1, 1]} : vector<16x134xbf16> to vector<16x132xbf16>
      %cst_11 = arith.constant dense<0.000000e+00> : vector<32x132xf32>
      %27 = tpu.matmul %25, %26, %cst_11 {dimension_numbers = #tpu.dot_dimension_numbers<[1], [0], [0], [1], [0, 0, 1, 1], [], []>} : vector<32x16xbf16>, vector<16x132xbf16>, vector<32x132xf32> -> vector<32x132xf32>
      %28 = arith.addf %23, %27 : vector<32x132xf32>
      %c2 = arith.constant 2 : index
      %c0_12 = arith.constant 0 : index
      %c0_13 = arith.constant 0 : index
      %29 = vector.load %arg4[%c2, %c0_12, %c0_13] : memref<3x32x16xbf16, #tpu.memory_space<vmem>>, vector<1x32x16xbf16>
      %30 = vector.shape_cast %29 : vector<1x32x16xbf16> to vector<32x16xbf16>
      %31 = vector.extract_strided_slice %19 {offsets = [0, 2], sizes = [16, 132], strides = [1, 1]} : vector<16x134xbf16> to vector<16x132xbf16>
      %cst_14 = arith.constant dense<0.000000e+00> : vector<32x132xf32>
      %32 = tpu.matmul %30, %31, %cst_14 {dimension_numbers = #tpu.dot_dimension_numbers<[1], [0], [0], [1], [0, 0, 1, 1], [], []>} : vector<32x16xbf16>, vector<16x132xbf16>, vector<32x132xf32> -> vector<32x132xf32>
      %33 = arith.addf %28, %32 : vector<32x132xf32>
      %c0_15 = arith.constant 0 : index
      %c0_16 = arith.constant 0 : index
      %34 = vector.load %arg5[%c0_15, %c0_16] : memref<32x1xf32, #tpu.memory_space<vmem>>, vector<32x1xf32>
      %35 = vector.broadcast %34 : vector<32x1xf32> to vector<32x132xf32>
      %36 = arith.addf %33, %35 : vector<32x132xf32>
      %37 = vector.extract_strided_slice %4 {offsets = [0, 1], sizes = [1, 132], strides = [1, 1]} : vector<1x134xf32> to vector<1x132xf32>
      %38 = vector.broadcast %37 : vector<1x132xf32> to vector<32x132xf32>
      %39 = arith.mulf %36, %38 : vector<32x132xf32>
      %cst_17 = arith.constant 0.000000e+00 : f32
      %40 = vector.broadcast %cst_17 : f32 to vector<32x132xf32>
      %41 = arith.maximumf %39, %40 : vector<32x132xf32>
      %42 = arith.truncf %41 : vector<32x132xf32> to vector<32x132xbf16>
      %c0_18 = arith.constant 0 : index
      %c0_19 = arith.constant 0 : index
      %c0_20 = arith.constant 0 : index
      %43 = vector.load %arg6[%c0_18, %c0_19, %c0_20] : memref<3x32x32xbf16, #tpu.memory_space<vmem>>, vector<1x32x32xbf16>
      %44 = vector.shape_cast %43 : vector<1x32x32xbf16> to vector<32x32xbf16>
      %45 = vector.extract_strided_slice %42 {offsets = [0, 0], sizes = [32, 130], strides = [1, 1]} : vector<32x132xbf16> to vector<32x130xbf16>
      %cst_21 = arith.constant dense<0.000000e+00> : vector<32x130xf32>
      %46 = tpu.matmul %44, %45, %cst_21 {dimension_numbers = #tpu.dot_dimension_numbers<[1], [0], [0], [1], [0, 0, 1, 1], [], []>} : vector<32x32xbf16>, vector<32x130xbf16>, vector<32x130xf32> -> vector<32x130xf32>
      %c1_22 = arith.constant 1 : index
      %c0_23 = arith.constant 0 : index
      %c0_24 = arith.constant 0 : index
      %47 = vector.load %arg6[%c1_22, %c0_23, %c0_24] : memref<3x32x32xbf16, #tpu.memory_space<vmem>>, vector<1x32x32xbf16>
      %48 = vector.shape_cast %47 : vector<1x32x32xbf16> to vector<32x32xbf16>
      %49 = vector.extract_strided_slice %42 {offsets = [0, 1], sizes = [32, 130], strides = [1, 1]} : vector<32x132xbf16> to vector<32x130xbf16>
      %cst_25 = arith.constant dense<0.000000e+00> : vector<32x130xf32>
      %50 = tpu.matmul %48, %49, %cst_25 {dimension_numbers = #tpu.dot_dimension_numbers<[1], [0], [0], [1], [0, 0, 1, 1], [], []>} : vector<32x32xbf16>, vector<32x130xbf16>, vector<32x130xf32> -> vector<32x130xf32>
      %51 = arith.addf %46, %50 : vector<32x130xf32>
      %c2_26 = arith.constant 2 : index
      %c0_27 = arith.constant 0 : index
      %c0_28 = arith.constant 0 : index
      %52 = vector.load %arg6[%c2_26, %c0_27, %c0_28] : memref<3x32x32xbf16, #tpu.memory_space<vmem>>, vector<1x32x32xbf16>
      %53 = vector.shape_cast %52 : vector<1x32x32xbf16> to vector<32x32xbf16>
      %54 = vector.extract_strided_slice %42 {offsets = [0, 2], sizes = [32, 130], strides = [1, 1]} : vector<32x132xbf16> to vector<32x130xbf16>
      %cst_29 = arith.constant dense<0.000000e+00> : vector<32x130xf32>
      %55 = tpu.matmul %53, %54, %cst_29 {dimension_numbers = #tpu.dot_dimension_numbers<[1], [0], [0], [1], [0, 0, 1, 1], [], []>} : vector<32x32xbf16>, vector<32x130xbf16>, vector<32x130xf32> -> vector<32x130xf32>
      %56 = arith.addf %51, %55 : vector<32x130xf32>
      %c0_30 = arith.constant 0 : index
      %c0_31 = arith.constant 0 : index
      %57 = vector.load %arg7[%c0_30, %c0_31] : memref<32x1xf32, #tpu.memory_space<vmem>>, vector<32x1xf32>
      %58 = vector.broadcast %57 : vector<32x1xf32> to vector<32x130xf32>
      %59 = arith.addf %56, %58 : vector<32x130xf32>
      %60 = vector.extract_strided_slice %4 {offsets = [0, 2], sizes = [1, 130], strides = [1, 1]} : vector<1x134xf32> to vector<1x130xf32>
      %61 = vector.broadcast %60 : vector<1x130xf32> to vector<32x130xf32>
      %62 = arith.mulf %59, %61 : vector<32x130xf32>
      %cst_32 = arith.constant 0.000000e+00 : f32
      %63 = vector.broadcast %cst_32 : f32 to vector<32x130xf32>
      %64 = arith.maximumf %62, %63 : vector<32x130xf32>
      %65 = arith.truncf %64 : vector<32x130xf32> to vector<32x130xbf16>
      %c0_33 = arith.constant 0 : index
      %c0_34 = arith.constant 0 : index
      %c0_35 = arith.constant 0 : index
      %66 = vector.load %arg8[%c0_33, %c0_34, %c0_35] : memref<3x8x32xbf16, #tpu.memory_space<vmem>>, vector<1x8x32xbf16>
      %67 = vector.shape_cast %66 : vector<1x8x32xbf16> to vector<8x32xbf16>
      %cst_36 = arith.constant dense<0.000000e+00> : vector<8x130xf32>
      %68 = tpu.matmul %67, %65, %cst_36 {dimension_numbers = #tpu.dot_dimension_numbers<[1], [0], [0], [1], [0, 0, 1, 1], [], []>} : vector<8x32xbf16>, vector<32x130xbf16>, vector<8x130xf32> -> vector<8x130xf32>
      %c1_37 = arith.constant 1 : index
      %c0_38 = arith.constant 0 : index
      %c0_39 = arith.constant 0 : index
      %69 = vector.load %arg8[%c1_37, %c0_38, %c0_39] : memref<3x8x32xbf16, #tpu.memory_space<vmem>>, vector<1x8x32xbf16>
      %70 = vector.shape_cast %69 : vector<1x8x32xbf16> to vector<8x32xbf16>
      %cst_40 = arith.constant dense<0.000000e+00> : vector<8x130xf32>
      %71 = tpu.matmul %70, %65, %cst_40 {dimension_numbers = #tpu.dot_dimension_numbers<[1], [0], [0], [1], [0, 0, 1, 1], [], []>} : vector<8x32xbf16>, vector<32x130xbf16>, vector<8x130xf32> -> vector<8x130xf32>
      %c2_41 = arith.constant 2 : index
      %c0_42 = arith.constant 0 : index
      %c0_43 = arith.constant 0 : index
      %72 = vector.load %arg8[%c2_41, %c0_42, %c0_43] : memref<3x8x32xbf16, #tpu.memory_space<vmem>>, vector<1x8x32xbf16>
      %73 = vector.shape_cast %72 : vector<1x8x32xbf16> to vector<8x32xbf16>
      %cst_44 = arith.constant dense<0.000000e+00> : vector<8x130xf32>
      %74 = tpu.matmul %73, %65, %cst_44 {dimension_numbers = #tpu.dot_dimension_numbers<[1], [0], [0], [1], [0, 0, 1, 1], [], []>} : vector<8x32xbf16>, vector<32x130xbf16>, vector<8x130xf32> -> vector<8x130xf32>
      %75 = vector.extract_strided_slice %68 {offsets = [0, 0], sizes = [8, 128], strides = [1, 1]} : vector<8x130xf32> to vector<8x128xf32>
      %76 = vector.extract_strided_slice %71 {offsets = [0, 1], sizes = [8, 128], strides = [1, 1]} : vector<8x130xf32> to vector<8x128xf32>
      %77 = arith.addf %75, %76 : vector<8x128xf32>
      %78 = vector.extract_strided_slice %74 {offsets = [0, 2], sizes = [8, 128], strides = [1, 1]} : vector<8x130xf32> to vector<8x128xf32>
      %79 = arith.addf %77, %78 : vector<8x128xf32>
      %c0_45 = arith.constant 0 : index
      %c0_46 = arith.constant 0 : index
      %80 = vector.load %arg9[%c0_45, %c0_46] : memref<8x1xf32, #tpu.memory_space<vmem>>, vector<8x1xf32>
      %81 = vector.broadcast %80 : vector<8x1xf32> to vector<8x128xf32>
      %82 = arith.addf %79, %81 : vector<8x128xf32>
      %83 = vector.broadcast %5 : vector<1x128xf32> to vector<8x128xf32>
      %84 = arith.mulf %82, %83 : vector<8x128xf32>
      %c0_47 = arith.constant 0 : index
      %c0_48 = arith.constant 0 : index
      %c0_49 = arith.constant 0 : index
      %85 = vector.load %arg10[%c0_47, %c0_48, %c0_49] : memref<1x8x128xf32, #tpu.memory_space<vmem>>, vector<1x8x128xf32>
      %86 = vector.shape_cast %85 : vector<1x8x128xf32> to vector<8x128xf32>
      %87 = vector.shape_cast %84 : vector<8x128xf32> to vector<1x8x128xf32>
      tpu.vector_store %arg10[%c0_47, %c0_48, %c0_49], %87 {strides = array<i32>} : memref<1x8x128xf32, #tpu.memory_space<vmem>>, vector<1x8x128xf32>,
    } else {
    }
    %true = arith.constant true
    %13 = arith.xori %10, %true : i1
    %14 = arith.extui %13 : i1 to i32
    %c0_i32_2 = arith.constant 0 : i32
    %15 = arith.cmpi ne, %14, %c0_i32_2 : i32
    scf.if %15 {
      %cst_3 = arith.constant 0.000000e+00 : f32
      %16 = vector.broadcast %cst_3 : f32 to vector<8x128xf32>
      %c0_4 = arith.constant 0 : index
      %c0_5 = arith.constant 0 : index
      %c0_6 = arith.constant 0 : index
      %17 = vector.load %arg10[%c0_4, %c0_5, %c0_6] : memref<1x8x128xf32, #tpu.memory_space<vmem>>, vector<1x8x128xf32>
      %18 = vector.shape_cast %17 : vector<1x8x128xf32> to vector<8x128xf32>
      %19 = vector.shape_cast %16 : vector<8x128xf32> to vector<1x8x128xf32>
      tpu.vector_store %arg10[%c0_4, %c0_5, %c0_6], %19 {strides = array<i32>} : memref<1x8x128xf32, #tpu.memory_space<vmem>>, vector<1x8x128xf32>,
    } else {
    }
    return
  }
  func.func @transform_0(%arg0: i32, %arg1: i32) -> (i32, i32, i32) {
    %c0_i32 = arith.constant 0 : i32
    %c0_i32_0 = arith.constant 0 : i32
    %c0_i32_1 = arith.constant 0 : i32
    return %arg0, %c0_i32, %c0_i32_0 : i32, i32, i32
  }
  func.func @transform_1(%arg0: i32, %arg1: i32) -> (i32, i32, i32) {
    %c0_i32 = arith.constant 0 : i32
    %c0_i32_0 = arith.constant 0 : i32
    %c0_i32_1 = arith.constant 0 : i32
    return %arg0, %c0_i32, %c0_i32_0 : i32, i32, i32
  }
  func.func @transform_2(%arg0: i32, %arg1: i32) -> (i32, i32, i32) {
    %c0_i32 = arith.constant 0 : i32
    %c0_i32_0 = arith.constant 0 : i32
    %c0_i32_1 = arith.constant 0 : i32
    %c0_i32_2 = arith.constant 0 : i32
    return %c0_i32, %c0_i32_0, %c0_i32_1 : i32, i32, i32
  }
  func.func @transform_3(%arg0: i32, %arg1: i32) -> (i32, i32) {
    %c0_i32 = arith.constant 0 : i32
    %c0_i32_0 = arith.constant 0 : i32
    %c0_i32_1 = arith.constant 0 : i32
    return %c0_i32, %c0_i32_0 : i32, i32
  }
  func.func @transform_4(%arg0: i32, %arg1: i32) -> (i32, i32, i32) {
    %c0_i32 = arith.constant 0 : i32
    %c0_i32_0 = arith.constant 0 : i32
    %c0_i32_1 = arith.constant 0 : i32
    %c0_i32_2 = arith.constant 0 : i32
    return %c0_i32, %c0_i32_0, %c0_i32_1 : i32, i32, i32
  }
  func.func @transform_5(%arg0: i32, %arg1: i32) -> (i32, i32) {
    %c0_i32 = arith.constant 0 : i32
    %c0_i32_0 = arith.constant 0 : i32
    %c0_i32_1 = arith.constant 0 : i32
    return %c0_i32, %c0_i32_0 : i32, i32
  }
  func.func @transform_6(%arg0: i32, %arg1: i32) -> (i32, i32, i32) {
    %c0_i32 = arith.constant 0 : i32
    %c0_i32_0 = arith.constant 0 : i32
    %c0_i32_1 = arith.constant 0 : i32
    %c0_i32_2 = arith.constant 0 : i32
    return %c0_i32, %c0_i32_0, %c0_i32_1 : i32, i32, i32
  }
  func.func @transform_7(%arg0: i32, %arg1: i32) -> (i32, i32) {
    %c0_i32 = arith.constant 0 : i32
    %c0_i32_0 = arith.constant 0 : i32
    %c0_i32_1 = arith.constant 0 : i32
    return %c0_i32, %c0_i32_0 : i32, i32
  }
  func.func @transform_8(%arg0: i32, %arg1: i32) -> (i32, i32, i32) {
    %c0_i32 = arith.constant 0 : i32
    %c0_i32_0 = arith.constant 0 : i32
    return %arg0, %c0_i32, %arg1 : i32, i32, i32
  }
}

</mosaic_0001>

<bundles_post_ra>
// kernel: tpu_custom_call.1
= control target key start
LH: loop header
LB: loop body
LE: loop exit
PB: predicated region body
PF: predicated region fallthrough
CT: control target
= control target key end

     0   :  { %s2129_s0 = inlined_call_operand.hbm [shape: f32[4,16,262], index: 0, kind: input, shape index: {}]   ;;  %s2130_s1 = inlined_call_operand.vmem [shape: f32[4,1,262], index: 1, kind: input, shape index: {}]   ;;  %s2131_s2 = inlined_call_operand.vmem [shape: bf16[3,32,16], index: 2, kind: input, shape index: {}]   ;;  %s2132_s3 = inlined_call_operand.vmem [shape: f32[32,1], index: 3, kind: input, shape index: {}]   ;;  %s2133_s4 = inlined_call_operand.vmem [shape: bf16[3,32,32], index: 4, kind: input, shape index: {}]   ;;  %s2134_s5 = inlined_call_operand.vmem [shape: f32[32,1], index: 5, kind: input, shape index: {}]   ;;  %s2135_s6 = inlined_call_operand.vmem [shape: bf16[3,8,32], index: 6, kind: input, shape index: {}]   ;;  %s2136_s7 = inlined_call_operand.vmem [shape: f32[8,1], index: 7, kind: input, shape index: {}]   ;;  %s2137_s8 = inlined_call_operand.hbm [shape: f32[4,8,256], index: 8, kind: output, shape index: {}]  }
   0x1   :  { %2145 = sst [smem:[#allocation14_spill]] %s2137_s8 }
   0x2   :  { %13 = vsyncpa [#allocation3], 0 }
   0x3   :  { %15 = vsyncpa [#allocation3 + $0x1], 0 }
   0x4   :  { %16 = vsyncpa [#allocation4], 0 }
   0x5   :  { %18 = vsyncpa [#allocation4 + $0x1], 0  ;;  %s1744_s27 = smov 0   ;;  %s1746_s28 = smov 0  }
   0x6   :  { %s1748_s29 = smov 0   ;;  %s1750_s30 = smov 0  }
   0x7   :  { %s1752_s9 = smov 0   ;;  %s1754_s10 = smov 0  }
   0x8   :  { %s1756_s11 = smov 0   ;;  %s1758_s12 = smov 0  }
   0x9   :  { %s1760_s13 = smov 0   ;;  %s1762_s14 = smov 0  }
   0xa   :  { %s1764_s15 = smov 0  }
   0xb LB: > { %2146 = sst [smem:[#allocation8_spill]] %s1668_s10  ;;  %s1316_s16 = sadd.s32 4294967295, %s1688_s15   ;;  %s1688_s15 = sphi %s1764_s15, %s24_s15   ;;  %s1684_s14 = sphi %s1762_s14, %s2166_s14   ;;  %s1680_s13 = sphi %s1760_s13, %s2173_s13   ;;  %s1676_s12 = sphi %s1758_s12, %s2172_s12   ;;  %s1672_s11 = sphi %s1756_s11, %s2163_s11   ;;  %s1668_s10 = sphi %s1754_s10, %s2162_s10   ;;  %s1664_s9 = sphi %s1752_s9, %s2171_s9   ;;  %s1660_s30 = sphi %s1750_s30, %s2170_s30   ;;  %s1656_s29 = sphi %s1748_s29, %s2169_s29   ;;  %s1652_s28 = sphi %s1746_s28, %s2168_s28   ;;  %s1648_s27 = sphi %s1744_s27, %s2167_s27  }
   0xc   : > { %2147 = sst [smem:[#allocation9_spill]] %s1680_s13  ;;  %s1317_s17 = sadd.s32 4294967294, %s1688_s15  }
   0xd   : > { %2148 = sst [smem:[#allocation10_spill]] %s1684_s14  ;;  %s33_s18 = sadd.s32 1, %s1680_s13 }
   0xe   : > { %s36_s19 = sadd.s32 1, %s1684_s14  ;;  %p34_p0 = scmp.ge.s32.totalorder %s33_s18, 2 }
   0xf   : > { %s43_s20 = sadd.s32 1, %s1668_s10  ;;  %p50_p1 = scmp.ne.s32.totalorder %s1668_s10, %s1664_s9 }
  0x10   : > { %p51_p2 = scmp.eq.s32.totalorder %s1688_s15, 0  ;;  %s2175_s18 = smov (%p34_p0, %s33_s18), 0 }
  0x11   : > { %2149 = sst [smem:[#allocation11_spill]] %s2175_s18  ;;  %s2177_s19 = smov (!%p34_p0, %s36_s19), %s1684_s14 }
  0x12   : > { %p1808_p3 = por %p51_p2, %p50_p1  ;;  %p56_p4 = scmp.ne.s32.totalorder %s1664_s9, %s1660_s30 }
  0x13   : > { %p38_p5 = scmp.ge.s32.totalorder %s2177_s19, 4  ;;  %p57_p6 = scmp.eq.s32.totalorder %s1316_s16, 0 }
  0x14   : > { %s219_s22 = ssub.s32 %s1680_s13, %s2175_s18  ;;  %s223_s23 = sadd.s32 1, %s1656_s29 }
  0x15   : > { %s2179_s19 = smov (%p38_p5, %s2177_s19), 0  ;;  %p1818_p7 = por %p57_p6, %p56_p4 }
  0x16   : > { %2151 = sst [smem:[#allocation12_spill]] %s2179_s19  ;;  %p233_p8 = scmp.ne.s32.totalorder %s1656_s29, %s1652_s28 }
  0x17   : > { %s40_s25 = ssub.s32 %s1684_s14, %s2179_s19  ;;  %p234_p9 = scmp.eq.s32.totalorder %s1316_s16, 7 }
  0x18   : > { %p41_p10 = scmp.eq.s32.totalorder %s40_s25, 0  ;;  %s220_s26 = sor.u32 %s219_s22, %s40_s25 }
  0x19   : > { %p221_p11 = scmp.eq.s32.totalorder %s220_s26, 0  ;;  %p1826_p12 = por %p234_p9, %p233_p8 }
  0x1a   : > { %s1831_s18 = scalar_select %p41_p10, %s1668_s10, %s43_s20  }
  0x1b   : > { %s2153_s30 = scalar_select %p1826_p12, 1, 0 }
  0x1c   : > { %2154 = sst [smem:[#allocation13_spill]] %s1831_s18  ;;  %p239_p13 = scmp.ne.s32.totalorder %s1652_s28, %s1648_s27 }
  0x1d   : > { %s1834_s13 = scalar_select %p221_p11, %s1656_s29, %s223_s23  }
  0x1e   : > { %p240_p0 = scmp.eq.s32.totalorder %s1317_s17, 7  ;;  %p1425_p1 = scmp.lt.s32.totalorder %s1688_s15, 8 }
  0x1f   : > { %s278_s16 = sand.u32 1, %s1668_s10   ;;  %s1408_s22 = smul.u32 768, %s1684_s14 }
  0x20   : > { %p1839_p2 = por %p240_p0, %p239_p13  ;;  %s1407_s19 = smul.u32 48, %s278_s16 }
  0x21   : > { %p1847_p4 = pnand %p1425_p1, %p1808_p3  ;;  %s1854_s23 = scalar_lea.hbm %s2129_s0, %s1408_s22 }
  0x22   : > { %s2155_s8 = scalar_select %p1839_p2, 1, 0 }
  0x23   : > { %s282_s17 = scalar_lea.vmem [#allocation2], %s1407_s19  ;;  %s1859_s21 = scalar_lea.sflag [#allocation3], %s278_s16 }
  0x24   : > { %s289_s18 = sshll.u32 %s282_s17, 4  ;;  %s1536_s14 = scalar_lea.hbm %s1854_s23, 768  ;;  %s1856_s18 = int_to_ptr.vmem [resolvable:$true] %s289_s18 }
  0x25   : > { %p1537_p3 = scmp.ne.s32.totalorder %s1854_s23, %s1536_s14  ;;  %p1538_p6 = pneg %p1847_p4 }
  0x26   : > { %s1541_s20 = scalar_lea.hbm %s2129_s0, 3072  ;;  %p1542_p10 = scmp.lt.u32.totalorder %s1854_s23, %s2129_s0 }
  0x27   : > { %p1539_p8 = pnand %p1538_p6, %p1537_p3  ;;  %p1543_p11 = scmp.lt.u32.totalorder %s1541_s20, %s1536_s14 }
  0x28   : > { %p1545_p0 = scmp.lt.u32.totalorder %s1536_s14, %s1854_s23 }
  0x29   : > { %p1540_p9 = pneg %p1539_p8  ;;  %p1544_p13 = por %p1543_p11, %p1542_p10 }
  0x2b   : > { %p1546_p1 = por %p1545_p0, %p1544_p13 }
  0x2d   : > { %p1547_p5 = pnand %p1546_p1, %p1540_p9 }
  0x2f   : > { %1550 = shalt.err (!%p1547_p5)
}
  0x30   : > { %s1551_s16 = scalar_lea.vmem %s1856_s18, 768  ;;  %s1690_s17 = smov [#allocation2]  }
  0x31   : > { %p1552_p3 = scmp.ne.s32.totalorder %s1856_s18, %s1551_s16  ;;  %s1556_s22 = sshll.u32 %s1690_s17, 4  ;;  %s1557_s22 = int_to_ptr.vmem [resolvable:$false] %s1556_s22 }
  0x32   : > { %s1558_s10 = scalar_lea.vmem %s1557_s22, 1536  ;;  %p1559_p12 = scmp.lt.s32.totalorder %s1856_s18, %s1557_s22 }
  0x33   : > { %p1554_p8 = pnand %p1552_p3, %p1538_p6  ;;  %p1560_p10 = scmp.lt.s32.totalorder %s1558_s10, %s1551_s16 }
  0x35   : > { %p1555_p2 = pneg %p1554_p8  ;;  %p1561_p11 = por %p1560_p10, %p1559_p12 }
  0x37   : > { %p1562_p13 = pnand %p1561_p11, %p1555_p2 }
  0x39   : > { %1565 = shalt.err (!%p1562_p13)
}
  0x3a   : > { %s1691_s14 = smov 384   ;;  %s1692_s26 = smov 24  }
  0x3b   : > { %1420 = dma.hbm_to_vmem [thread:$0]  (!%p1847_p4), %s1854_s23, 768, %s1856_s18, %s1859_s21, %s1691_s14, %s1691_s14, %s1692_s26  }
  0x3c   : > { %p304_p5 = scmp.lt.s32.totalorder %s1688_s15, 9  ;;  %p2157_p6 = scmp.ge.s32.totalorder %s1688_s15, 1 }
  0x3e   : > { %p305_p9 = pnand %p2157_p6, %p304_p5 }
  0x3f   : > { %s310_s20 = sand.u32 (!%p305_p9), 1, %s1664_s9  }
  0x40   : > { %308 = sbr.rel (%p305_p9) target bundleno = 1446 (0x5a6), region = 52  ;;  %s311_s16 = scalar_lea.sflag (!%p305_p9), [#allocation3], %s310_s20 }
  0x41   : > { %s1891_s19 = smul.u32 (!%p305_p9), 48, %s310_s20 }
  0x43   : > { %s314_s17 = scalar_lea.vmem (!%p305_p9), [#allocation2], %s1891_s19 }
  0x47   : > { %1639 = dma.done.wait (%p1818_p7), %s311_s16, 768  }
  0x48   : > { %1641 = vsyncadd (%p1818_p7), %s311_s16, 4294966528  ;;  %s348_s18 = sand.u32 1, %s1652_s28   ;;  %p351_p12 = scmp.lt.s32.totalorder %s1676_s12, 3  ;;  %v362_v0 = vlaneseq  ;;  %vm372_vm0 = vcmask 1040408   ;;  %vm374_vm1 = vcmask 16384  }
  0x49   : > { %s1322_s25 = sshll.u32 %s348_s18, 3  ;;  %s1323_s23 = sshll.u32 %s1672_s11, 7 }
  0x4a   : > { %v363_v1 = vshrl.u32 %v362_v0, 7  ;;  %s352_s21 = scalar_select %p351_p12, %s1676_s12, 3 }
  0x4b   : > { %s357_s10 = sshra.s32 %s1323_s23, 7  ;;  %s1916_s23 = scalar_lea.vmem [#allocation5], %s1322_s25 }
  0x4c   : > { %s1410_s22 = smul.u32 3, %s352_s21  ;;  %v364_v2 = vsub.s32 0, %v363_v1  ;;  %v368_v3 = vsub.s32 1, %v363_v1 }
  0x4e   : > { %s354_s26 = scalar_lea.vmem %s2130_s1, %s1410_s22 }
  0x4f   : > { %s359_s20 = scalar_lea.vmem %s354_s26, %s357_s10 }
  0x50   : > { %v360_v4 = vld [vmem:[%s359_s20] sm:$0x3] }
  0x51   : > { %v1907_v5 = vrot.slane %v360_v4, %v364_v2  ;;  %v1909_v6 = vrot.slane %v360_v4, %v368_v3 }
  0x53   : > { %v373_v7 = vsel %vm372_vm0, %v1907_v5, -inf  ;;  %v375_v8 = vsel %vm374_vm1, %v1909_v6, -inf }
  0x54   : > { %v376_v9 = vmax.f32 %v373_v7, %v375_v8 }
  0x56   : > { %377 = vmax.xlane.f32.xlu0 %v376_v9 }
  0xe3   : > { %v378_v10 = vpop.xlane.xlu0 %377 }
  0xe4   : > { %v379_v11 = vrot.slane %v378_v10, 4 }
  0xe6   : > { %v380_v12 = vmax.f32 %v378_v10, %v379_v11 }
  0xe8   : > { %v381_v13 = vrot.slane %v380_v12, 2 }
  0xea   : > { %v382_v14 = vmax.f32 %v380_v12, %v381_v13 }
  0xec   : > { %v383_v15 = vrot.slane %v382_v14, 1 }
  0xee   : > { %v384_v16 = vmax.f32 %v382_v14, %v383_v15 }
  0xf0   : > { %1411 = vpush %v384_v16 }
 0x121   : > { %s1913_s16 = spop %1411 }
 0x122   : > { %p386_p7 = scmp.gt.f32.partialorder %s1913_s16, 0.0 }
 0x123   : > { %s1324_s21 = sshll.u32 (%p386_p7), %s357_s10, 3  ;;  %v1693_v17 = vmov (%p386_p7), 0   ;;  %s1694_s25 = smov (%p386_p7), 127   ;;  %v647_v24 = vld [vmem:[%s2132_s3 + $0x8] sm:$0xff] (%p386_p7)  ;;  %v646_v25 = vld [vmem:[%s2132_s3] sm:$0xff] (%p386_p7)  ;;  %v648_v26 = vld [vmem:[%s2132_s3 + $0x10] sm:$0xff] (%p386_p7) }
 0x124   : > { %389 = sbr.rel (!%p386_p7) target bundleno = 1412 (0x584), region = 60  ;;  %s391_s22 = scalar_lea.vmem (%p386_p7), %s314_s17, %s1324_s21 [#allocation2]  ;;  %466 = vmatprep.mubr.bf16.mxu0 (%p386_p7), %v1693_v17  ;;  %1523 = vset.pattern.permute.xlu1 (%p386_p7), %v1693_v17  ;;  %v649_v27 = vld [vmem:[%s2132_s3 + $0x18] sm:$0xff] (%p386_p7)  ;;  %vm423_vm2 = vcmask (%p386_p7), 1039360   ;;  %v1524_v32 = vld [vmem:[%s2131_s2 + $0x10] sm:$0xff] (%p386_p7)   ;;  %vm427_vm3 = vcmask (%p386_p7), 130048   ;;  %vm575_vm4 = vcmask (%p386_p7), 1031168  }
 0x125   : > { %v392_v18 = vld [vmem:[%s391_s22] sm:$0xff] (%p386_p7)  ;;  %v394_v19 = vld [vmem:[%s391_s22 + $0x18] sm:$0xff] (%p386_p7)  ;;  %v393_v20 = vld [vmem:[%s391_s22 + $0x8] sm:$0xff] (%p386_p7)  ;;  %1522 = vset.pattern.permute.xlu0 (%p386_p7), %v1693_v17  ;;  %782 = vmatprep.mubr.bf16.mxu1 (%p386_p7), %v1693_v17  ;;  %s1695_s19 = smov (%p386_p7), 126   ;;  %vm743_vm5 = vcmask (%p386_p7), 261120   ;;  %s1696_s17 = smov (%p386_p7), 125  }
 0x126   : > { %v396_v21 = vpack.c.bf16 (%p386_p7), %v394_v19, %v392_v18  ;;  %v395_v22 = vld [vmem:[%s391_s22 + $0x20] sm:$0xff] (%p386_p7)  ;;  %v1525_v34 = vld [vmem:[%s2131_s2 + $0x18] sm:$0xff] (%p386_p7)   ;;  %v1527_v37 = vld [vmem:[%s2131_s2 + $0x8] sm:$0xff] (%p386_p7)   ;;  %vm1193_vm6 = vcmask (%p386_p7), 1022976  }
 0x127   : > { %v397_v23 = vpack.c.bf16 (%p386_p7), %v395_v22, %v393_v20  ;;  %v1526_v35 = vld [vmem:[%s2131_s2] sm:$0xff] (%p386_p7)   ;;  %v1529_v39 = vld [vmem:[%s2131_s2 + $0x28] sm:$0xff] (%p386_p7)  }
 0x128   : > { %419 = vrot.lane.b32.xlu0 (%p386_p7), %v396_v21, %s1694_s25  ;;  %571 = vrot.lane.b32.xlu1 (%p386_p7), %v396_v21, %s1695_s19  ;;  %v1528_v38 = vld [vmem:[%s2131_s2 + $0x20] sm:$0xff] (%p386_p7)  }
 0x129   : > { %v968_v22 = vld [vmem:[%s2134_s5] sm:$0xff] (%p386_p7) }
 0x12c   : > { %421 = vrot.lane.b32.xlu0 %v397_v23, %s1694_s25  ;;  %573 = vrot.lane.b32.xlu1 %v397_v23, %s1695_s19 }
 0x130   : > { %657 = vperm.xlu1 %1523, %v647_v24   ;;  %652 = vperm.xlu0 %1522, %v646_v25   ;;  %v970_v24 = vld [vmem:[%s2134_s5 + $0x10] sm:$0xff]  ;;  %v971_v25 = vld [vmem:[%s2134_s5 + $0x18] sm:$0xff] }
 0x134   : > { %662 = vperm.xlu1 %1523, %v648_v26   ;;  %667 = vperm.xlu0 %1522, %v649_v27   ;;  %v1182_v26 = vld [vmem:[%s2136_s7] sm:$0xff] }
 0x138   : > { %678 = vrot.lane.b32.xlu1 %v1907_v5, %s1694_s25  ;;  %680 = vrot.lane.b32.xlu0 %v1909_v6, %s1694_s25 }
 0x19a   : > { %v420_v28 = vpop.permute.xlu0 %419  ;;  %v572_v29 = vpop.permute.xlu1 %571 }
 0x19e   : > { %v422_v30 = vpop.permute.xlu0 %421  ;;  %v574_v33 = vpop.permute.xlu1 %573 }
 0x19f   : > { %434 = vmatprep.subr.bf16.mxu0 %v422_v30  ;;  %v424_v31 = vsel %vm423_vm2, %v420_v28, %v422_v30  ;;  %v576_v36 = vsel %vm575_vm4, %v572_v29, %v574_v33 }
 0x1a0   : > { %435 = vmatpush1.bf16.msra.mxu0 %v424_v31 }
 0x1a1   : > { %503 = vmatprep.subr.bf16.mxu0 %v397_v23  ;;  %v969_v23 = vld [vmem:[%s2134_s5 + $0x8] sm:$0xff] }
 0x1a3   : > { %1331 = vmatmul.mubr.msk.bf16.vlgmr.msra.gmra.mrb[0].mxu0 %vm427_vm3, %v1524_v32 }
 0x1a4   : > { %504 = vmatpush1.bf16.msra.mxu0 %v396_v21  ;;  %476 = vmatprep.mubr.bf16.mxu0 %v1693_v17 }
 0x1a5   : > { %585 = vmatprep.subr.bf16.mxu0 %v574_v33  ;;  %v1530_v33 = vld [vmem:[%s2133_s4 + $0x10] sm:$0xff]  }
 0x1ab   : > { %1332 = vmatmul.mubr.msk.bf16.gmra.mrb[4].mxu0 %vm427_vm3, %v1525_v34  ;;  %v1531_v34 = vld [vmem:[%s2133_s4 + $0x18] sm:$0xff]  }
 0x1ac   : > { %535 = vmatprep.mubr.bf16.mxu0 %v1693_v17 }
 0x1af   : > { %v658_v40 = vpop.permute.xlu1 %657  ;;  %v653_v41 = vpop.permute.xlu0 %652 }
 0x1b3   : > { %1335 = vmatmul.mubr.msk.bf16.vlgmr.msra.gmra.mrb[0].mxu0 %vm427_vm3, %v1526_v35  ;;  %v663_v42 = vpop.permute.xlu1 %662  ;;  %v668_v43 = vpop.permute.xlu0 %667 }
 0x1b4   : > { %586 = vmatpush1.bf16.msra.mxu0 %v576_v36  ;;  %545 = vmatprep.mubr.bf16.mxu0 %v1693_v17 }
 0x1b7   : > { %v679_v44 = vpop.permute.xlu1 %678  ;;  %v681_v45 = vpop.permute.xlu0 %680 }
 0x1b8   : > { %v683_v47 = vsel %vm423_vm2, %v679_v44, %v681_v45  ;;  %v1535_v44 = vld [vmem:[%s2133_s4 + $0x28] sm:$0xff]  }
 0x1bb   : > { %1336 = vmatmul.mubr.msk.bf16.gmra.mrb[4].mxu0 %vm427_vm3, %v1527_v37  ;;  %v1532_v37 = vld [vmem:[%s2133_s4] sm:$0xff]  }
 0x1bc   : > { %617 = vmatprep.mubr.bf16.mxu0 %v1693_v17 }
 0x1c3   : > { %1343 = vmatmul.mubr.msk.bf16.vlgmr.msra.gmra.mrb[0].mxu0 %vm427_vm3, %v1528_v38 }
 0x1c4   : > { %627 = vmatprep.mubr.bf16.mxu0 %v1693_v17 }
 0x1cb   : > { %1344 = vmatmul.mubr.msk.bf16.gmra.mrb[4].mxu0 %vm427_vm3, %v1529_v39 }
 0x1cc   : > { %1064 = vmatprep.mubr.bf16.mxu0 %v1693_v17 }
 0x296   : > { %v619_v46 = vpop.f32.mrb[0].mxu0 }
 0x297   : > { %v670_v48 = vadd.f32 %v653_v41, %v619_v46  ;;  %v621_v49 = vpop.f32.mrb[1].mxu0 }
 0x298   : > { %v671_v50 = vadd.f32 %v653_v41, %v621_v49  ;;  %v623_v51 = vpop.f32.mrb[2].mxu0 }
 0x299   : > { %v672_v52 = vadd.f32 %v658_v40, %v623_v51  ;;  %v625_v53 = vpop.f32.mrb[3].mxu0  ;;  %v686_v54 = vmul.f32 %v683_v47, %v670_v48 }
 0x29a   : > { %v673_v55 = vadd.f32 %v658_v40, %v625_v53  ;;  %v687_v56 = vmul.f32 %v681_v45, %v671_v50 }
 0x29b   : > { %v688_v57 = vmul.f32 %v683_v47, %v672_v52  ;;  %v694_v60 = vmax.f32 %v686_v54, 0.0 }
 0x29c   : > { %v689_v58 = vmul.f32 %v681_v45, %v673_v55  ;;  %v695_v63 = vmax.f32 %v687_v56, 0.0 }
 0x29d   : > { %v696_v59 = vmax.f32 %v688_v57, 0.0 }
 0x29e   : > { %v697_v61 = vmax.f32 %v689_v58, 0.0  ;;  %v629_v62 = vpop.f32.mrb[4].mxu0 }
 0x29f   : > { %v674_v0 = vadd.f32 %v663_v42, %v629_v62  ;;  %v631_v1 = vpop.f32.mrb[5].mxu0  ;;  %v702_v2 = vpack.c.bf16 %v696_v59, %v694_v60 }
 0x2a0   : > { %v675_v3 = vadd.f32 %v663_v42, %v631_v1  ;;  %v633_v4 = vpop.f32.mrb[6].mxu0  ;;  %v703_v7 = vpack.c.bf16 %v697_v61, %v695_v63  ;;  %v1533_v42 = vld [vmem:[%s2133_s4 + $0x8] sm:$0xff]  }
 0x2a1   : > { %v690_v8 = vmul.f32 %v683_v47, %v674_v0  ;;  %v676_v9 = vadd.f32 %v668_v43, %v633_v4  ;;  %v635_v10 = vpop.f32.mrb[7].mxu0  ;;  %729 = vrot.lane.b32.xlu1 %v702_v2, %s1694_s25 }
 0x2a2   : > { %v691_v11 = vmul.f32 %v681_v45, %v675_v3  ;;  %v677_v12 = vadd.f32 %v668_v43, %v635_v10  ;;  %731 = vrot.lane.b32.xlu0 %v703_v7, %s1694_s25  ;;  %v1534_v43 = vld [vmem:[%s2133_s4 + $0x20] sm:$0xff]  }
 0x2a3   : > { %v692_v13 = vmul.f32 %v683_v47, %v676_v9  ;;  %v698_v15 = vmax.f32 %v690_v8, 0.0 }
 0x2a4   : > { %v693_v14 = vmul.f32 %v681_v45, %v677_v12  ;;  %v699_v18 = vmax.f32 %v691_v11, 0.0 }
 0x2a5   : > { %v700_v16 = vmax.f32 %v692_v13, 0.0 }
 0x2a6   : > { %v701_v19 = vmax.f32 %v693_v14, 0.0 }
 0x2a7   : > { %v704_v20 = vpack.c.bf16 %v700_v16, %v698_v15 }
 0x2a8   : > { %v705_v21 = vpack.c.bf16 %v701_v19, %v699_v18 }
 0x2a9   : > { %733 = vrot.lane.b32.xlu1 %v704_v20, %s1694_s25 }
 0x2aa   : > { %735 = vrot.lane.b32.xlu0 %v705_v21, %s1694_s25 }
 0x2ad   : > { %887 = vrot.lane.b32.xlu1 %v702_v2, %s1695_s19 }
 0x2ae   : > { %889 = vrot.lane.b32.xlu0 %v703_v7, %s1695_s19 }
 0x2b1   : > { %891 = vrot.lane.b32.xlu1 %v704_v20, %s1695_s19 }
 0x2b2   : > { %893 = vrot.lane.b32.xlu0 %v705_v21, %s1695_s19 }
 0x2b5   : > { %974 = vperm.xlu1 %1523, %v968_v22  }
 0x2b6   : > { %979 = vperm.xlu0 %1522, %v969_v23  }
 0x2b9   : > { %984 = vperm.xlu1 %1523, %v970_v24  }
 0x2ba   : > { %989 = vperm.xlu0 %1522, %v971_v25  }
 0x2bd   : > { %1000 = vrot.lane.b32.xlu1 %v1907_v5, %s1695_s19 }
 0x2be   : > { %1002 = vrot.lane.b32.xlu0 %v1909_v6, %s1695_s19 }
 0x2c1   : > { %1185 = vperm.xlu1 %1523, %v1182_v26  }
 0x313   : > { %v730_v27 = vpop.permute.xlu1 %729 }
 0x314   : > { %v732_v28 = vpop.permute.xlu0 %731 }
 0x315   : > { %750 = vmatprep.subr.bf16.mxu1 %v732_v28  ;;  %v737_v29 = vsel %vm423_vm2, %v730_v27, %v732_v28  ;;  %v1028_v27 = vld [vmem:[%s2135_s6] sm:$0xf]  ;;  %v1366_v28 = vld [vmem:[%s2135_s6 + $0x4] sm:$0xf] }
 0x316   : > { %751 = vmatpush1.bf16.msra.mxu1 %v737_v29  ;;  %v1368_v29 = vld [vmem:[%s2135_s6 + $0x8] sm:$0xf] }
 0x31b   : > { %v734_v30 = vpop.permute.xlu1 %733 }
 0x31c   : > { %v736_v31 = vpop.permute.xlu0 %735 }
 0x31d   : > { %752 = vmatprep.subr.bf16.mxu1 %v736_v31  ;;  %v738_v32 = vsel %vm423_vm2, %v734_v30, %v736_v31 }
 0x31e   : > { %753 = vmatpush1.bf16.msra.mxu1 %v738_v32 }
 0x31f   : > { %819 = vmatprep.subr.bf16.mxu1 %v703_v7  ;;  %v888_v36 = vpop.permute.xlu1 %887 }
 0x320   : > { %v890_v35 = vpop.permute.xlu0 %889 }
 0x321   : > { %1351 = vmatmul.mubr.msk.bf16.vlgmr.msra.gmra.mrb[0].mxu1 %vm743_vm5, %v1530_v33  ;;  %v895_v38 = vsel %vm575_vm4, %v888_v36, %v890_v35 }
 0x322   : > { %820 = vmatpush1.bf16.msra.mxu1 %v702_v2  ;;  %792 = vmatprep.mubr.bf16.mxu1 %v1693_v17 }
 0x323   : > { %821 = vmatprep.subr.bf16.mxu1 %v705_v21  ;;  %v892_v39 = vpop.permute.xlu1 %891 }
 0x324   : > { %v894_v40 = vpop.permute.xlu0 %893 }
 0x325   : > { %v896_v41 = vsel %vm575_vm4, %v892_v39, %v894_v40 }
 0x326   : > { %822 = vmatpush1.bf16.msra.mxu1 %v704_v20 }
 0x327   : > { %907 = vmatprep.subr.bf16.mxu1 %v890_v35 }
 0x329   : > { %1352 = vmatmul.mubr.msk.bf16.gmra.mrb[4].mxu1 %vm743_vm5, %v1531_v34 }
 0x32a   : > { %851 = vmatprep.mubr.bf16.mxu1 %v1693_v17 }
 0x331   : > { %1355 = vmatmul.mubr.msk.bf16.vlgmr.msra.gmra.mrb[0].mxu1 %vm743_vm5, %v1532_v37 }
 0x332   : > { %908 = vmatpush1.bf16.msra.mxu1 %v895_v38  ;;  %861 = vmatprep.mubr.bf16.mxu1 %v1693_v17 }
 0x333   : > { %909 = vmatprep.subr.bf16.mxu1 %v894_v40 }
 0x334   : > { %v975_v45 = vpop.permute.xlu1 %974 }
 0x335   : > { %v980_v46 = vpop.permute.xlu0 %979 }
 0x336   : > { %910 = vmatpush1.bf16.msra.mxu1 %v896_v41 }
 0x338   : > { %v985_v47 = vpop.permute.xlu1 %984 }
 0x339   : > { %1356 = vmatmul.mubr.msk.bf16.gmra.mrb[4].mxu1 %vm743_vm5, %v1533_v42  ;;  %v990_v48 = vpop.permute.xlu0 %989 }
 0x33a   : > { %939 = vmatprep.mubr.bf16.mxu1 %v1693_v17 }
 0x33c   : > { %v1001_v50 = vpop.permute.xlu1 %1000 }
 0x33d   : > { %v1003_v49 = vpop.permute.xlu0 %1002 }
 0x33e   : > { %v1005_v52 = vsel %vm575_vm4, %v1001_v50, %v1003_v49 }
 0x340   : > { %v1186_v41 = vpop.permute.xlu1 %1185 }
 0x341   : > { %1363 = vmatmul.mubr.msk.bf16.vlgmr.msra.gmra.mrb[0].mxu1 %vm743_vm5, %v1534_v43 }
 0x342   : > { %949 = vmatprep.mubr.bf16.mxu1 %v1693_v17 }
 0x349   : > { %1364 = vmatmul.mubr.msk.bf16.gmra.mrb[4].mxu1 %vm743_vm5, %v1535_v44 }
 0x34a   : > { %1109 = vmatprep.mubr.bf16.mxu1 %v1693_v17 }
 0x414   : > { %v941_v51 = vpop.f32.mrb[0].mxu1 }
 0x415   : > { %v992_v53 = vadd.f32 %v975_v45, %v941_v51  ;;  %v943_v54 = vpop.f32.mrb[1].mxu1 }
 0x416   : > { %v993_v55 = vadd.f32 %v975_v45, %v943_v54  ;;  %v945_v56 = vpop.f32.mrb[2].mxu1 }
 0x417   : > { %v994_v57 = vadd.f32 %v980_v46, %v945_v56  ;;  %v1008_v58 = vmul.f32 %v1005_v52, %v992_v53  ;;  %v947_v59 = vpop.f32.mrb[3].mxu1 }
 0x418   : > { %v1009_v60 = vmul.f32 %v1003_v49, %v993_v55  ;;  %v995_v61 = vadd.f32 %v980_v46, %v947_v59 }
 0x419   : > { %v1010_v62 = vmul.f32 %v1005_v52, %v994_v57  ;;  %v1016_v0 = vmax.f32 %v1008_v58, 0.0 }
 0x41a   : > { %v1011_v63 = vmul.f32 %v1003_v49, %v995_v61  ;;  %v1017_v2 = vmax.f32 %v1009_v60, 0.0 }
 0x41b   : > { %v1018_v1 = vmax.f32 %v1010_v62, 0.0 }
 0x41c   : > { %v1019_v3 = vmax.f32 %v1011_v63, 0.0  ;;  %v951_v4 = vpop.f32.mrb[4].mxu1 }
 0x41d   : > { %v1024_v7 = vpack.c.bf16 %v1018_v1, %v1016_v0  ;;  %v996_v8 = vadd.f32 %v985_v47, %v951_v4  ;;  %v953_v9 = vpop.f32.mrb[5].mxu1 }
 0x41e   : > { %v997_v10 = vadd.f32 %v985_v47, %v953_v9  ;;  %v955_v11 = vpop.f32.mrb[6].mxu1  ;;  %v1025_v12 = vpack.c.bf16 %v1019_v3, %v1017_v2 }
 0x41f   : > { %v1012_v13 = vmul.f32 %v1005_v52, %v996_v8  ;;  %v998_v14 = vadd.f32 %v990_v48, %v955_v11  ;;  %v957_v15 = vpop.f32.mrb[7].mxu1 }
 0x420   : > { %v1013_v16 = vmul.f32 %v1003_v49, %v997_v10  ;;  %v999_v18 = vadd.f32 %v990_v48, %v957_v15  ;;  %1032 = vmatprep.subr.bf16.mxu0 %v1025_v12  ;;  %1077 = vmatprep.subr.bf16.mxu1 %v1025_v12 }
 0x421   : > { %v1014_v19 = vmul.f32 %v1005_v52, %v998_v14  ;;  %1033 = vmatpush1.bf16.msra.mxu0 %v1024_v7  ;;  %1078 = vmatpush1.bf16.msra.mxu1 %v1024_v7  ;;  %v1020_v21 = vmax.f32 %v1012_v13, 0.0 }
 0x422   : > { %v1015_v20 = vmul.f32 %v1003_v49, %v999_v18  ;;  %v1021_v23 = vmax.f32 %v1013_v16, 0.0 }
 0x423   : > { %v1022_v22 = vmax.f32 %v1014_v19, 0.0 }
 0x424   : > { %v1023_v24 = vmax.f32 %v1015_v20, 0.0 }
 0x425   : > { %v1026_v25 = vpack.c.bf16 %v1022_v22, %v1020_v21 }
 0x426   : > { %v1027_v26 = vpack.c.bf16 %v1023_v24, %v1021_v23 }
 0x428   : > { %1034 = vmatprep.subr.bf16.mxu0 %v1027_v26  ;;  %1079 = vmatprep.subr.bf16.mxu1 %v1027_v26 }
 0x429   : > { %1035 = vmatpush1.bf16.msra.mxu0 %v1026_v25  ;;  %1080 = vmatpush1.bf16.msra.mxu1 %v1026_v25 }
 0x42a   : > { %1123 = vmatprep.subr.bf16.mxu0 %v1025_v12 }
 0x42c   : > { %1365 = vmatmul.mubr.msk.bf16.vlgmr.msra.gmra.mrb[8].mxu0 %vm743_vm5, %v1028_v27  ;;  %1367 = vmatmul.mubr.msk.bf16.vlgmr.msra.gmra.mrb[8].mxu1 %vm743_vm5, %v1366_v28 }
 0x42d   : > { %1124 = vmatpush1.bf16.msra.mxu0 %v1024_v7  ;;  %1155 = vmatprep.mubr.bf16.mxu0 %v1693_v17 }
 0x42e   : > { %1125 = vmatprep.subr.bf16.mxu0 %v1027_v26 }
 0x431   : > { %1126 = vmatpush1.bf16.msra.mxu0 %v1026_v25 }
 0x434   : > { %1369 = vmatmul.mubr.msk.bf16.vlgmr.msra.gmra.mrb[12].mxu0 %vm743_vm5, %v1368_v29 }
 0x4ff   : > { %v1111_v30 = vpop.f32.mrb[8].mxu1  ;;  %v1066_v31 = vpop.f32.mrb[8].mxu0 }
 0x500   : > { %v1113_v32 = vpop.f32.mrb[9].mxu1  ;;  %1166 = vrot.lane.b32.xlu0 %v1111_v30, %s1694_s25  ;;  %v1068_v33 = vpop.f32.mrb[9].mxu0 }
 0x501   : > { %1168 = vrot.lane.b32.xlu1 %v1113_v32, %s1694_s25  ;;  %v1069_v34 = vpop.f32.mrb[10].mxu0  ;;  %v1115_v35 = vpop.f32.mrb[10].mxu1 }
 0x502   : > { %v1070_v36 = vpop.f32.mrb[11].mxu0  ;;  %v1116_v17 = vpop.f32.mrb[11].mxu1 }
 0x507   : > { %v1157_v37 = vpop.f32.mrb[12].mxu0 }
 0x508   : > { %v1159_v38 = vpop.f32.mrb[13].mxu0  ;;  %1175 = vrot.lane.b32.xlu0 %v1157_v37, %s1695_s19 }
 0x509   : > { %1177 = vrot.lane.b32.xlu1 %v1159_v38, %s1695_s19  ;;  %v1161_v39 = vpop.f32.mrb[14].mxu0 }
 0x50a   : > { %v1162_v40 = vpop.f32.mrb[15].mxu0 }
 0x50c   : > { %1189 = vrot.lane.b32.xlu0 %v1907_v5, %s1696_s17 }
 0x50d   : > { %1191 = vrot.lane.b32.xlu1 %v1909_v6, %s1696_s17 }
 0x572   : > { %v1167_v42 = vpop.permute.xlu0 %1166 }
 0x573   : > { %v1169_v43 = vpop.permute.xlu1 %1168 }
 0x574   : > { %v1170_v44 = vsel %vm423_vm2, %v1167_v42, %v1169_v43 }
 0x575   : > { %v1172_v46 = vadd.f32 %v1170_v44, %v1066_v31 }
 0x57a   : > { %v1176_v45 = vpop.permute.xlu0 %1175 }
 0x57b   : > { %v1178_v47 = vpop.permute.xlu1 %1177 }
 0x57c   : > { %v1179_v48 = vsel %vm575_vm4, %v1176_v45, %v1178_v47 }
 0x57d   : > { %v1181_v49 = vadd.f32 %v1179_v48, %v1172_v46 }
 0x57e   : > { %v1190_v50 = vpop.permute.xlu0 %1189 }
 0x57f   : > { %v1188_v51 = vadd.f32 %v1186_v41, %v1181_v49  ;;  %v1192_v52 = vpop.permute.xlu1 %1191 }
 0x580   : > { %v1194_v53 = vsel %vm1193_vm6, %v1190_v50, %v1192_v52 }
 0x581   : > { %v1196_v5 = vmul.f32 %v1194_v53, %v1188_v51 }
 0x583   : > { %1197 = vst [vmem:[%s1916_s23] sm:$0xff] %v1196_v5 }
 0x584 PF: > { %1200 = sbr.rel (%p386_p7) target bundleno = 1419 (0x58b), region = 64  ;;  %v1697_v6 = vmov (!%p386_p7), 0.0  }
 0x585   : > { %1201 = vst [vmem:[%s1916_s23] sm:$0xff] (!%p386_p7), %v1697_v6 }
 0x58b PF: > { %s1371_s25 = sshll.u32 %s1676_s12, 1  ;;  %s1218_s10 = sshll.u32 %s1916_s23, 4  ;;  %s2069_s10 = int_to_ptr.vmem [resolvable:$true] %s1218_s10 }
 0x58c   : > { %s1214_s19 = sadd.s32 %s1672_s11, %s1371_s25  ;;  %s2158_s20 = sld [smem:[#allocation14_spill]] }
 0x58d   : > { %s1372_s14 = sshll.u32 %s1214_s19, 7  ;;  %s1203_s21 = scalar_lea.sflag [#allocation4], %s348_s18 }
 0x58e   : > { %s1566_s22 = scalar_lea.vmem %s2069_s10, 128  ;;  %p2159_p4 = scmp.ne.s32.totalorder %s2153_s30, 0 }
 0x58f   : > { %p1567_p2 = scmp.ne.s32.totalorder %s2069_s10, %s1566_s22  ;;  %s1698_s12 = smov [#allocation5]  }
 0x590   : > { %s1570_s11 = sshll.u32 %s1698_s12, 4  ;;  %s1571_s11 = int_to_ptr.vmem [resolvable:$false] %s1570_s11 }
 0x591   : > { %p1568_p0 = pnand %p1567_p2, %p2159_p4  ;;  %s1572_s23 = scalar_lea.vmem %s1571_s11, 256 }
 0x592   : > { %s1216_s16 = scalar_lea.hbm %s2158_s20, %s1372_s14  ;;  %p1573_p3 = scmp.lt.s32.totalorder %s2069_s10, %s1571_s11 }
 0x593   : > { %p1569_p1 = pneg %p1568_p0  ;;  %p1574_p8 = scmp.lt.s32.totalorder %s1572_s23, %s1566_s22 }
 0x595   : > { %p1575_p10 = por %p1574_p8, %p1573_p3 }
 0x597   : > { %p1576_p11 = pnand %p1575_p10, %p1569_p1 }
 0x599   : > { %1579 = shalt.err (!%p1576_p11)
}
 0x59a   : > { %s1580_s17 = scalar_lea.hbm %s1216_s16, 128  ;;  %s1584_s19 = scalar_lea.hbm %s2158_s20, 1024 }
 0x59b   : > { %p1581_p13 = scmp.ne.s32.totalorder %s1216_s16, %s1580_s17  ;;  %p1585_p9 = scmp.lt.u32.totalorder %s1216_s16, %s2158_s20 }
 0x59c   : > { %p1586_p12 = scmp.lt.u32.totalorder %s1584_s19, %s1580_s17  ;;  %p1588_p2 = scmp.lt.u32.totalorder %s1580_s17, %s1216_s16 }
 0x59d   : > { %p1582_p5 = pnand %p1581_p13, %p2159_p4 }
 0x59e   : > { %p1587_p7 = por %p1586_p12, %p1585_p9 }
 0x59f   : > { %p1583_p6 = pneg %p1582_p5 }
 0x5a0   : > { %p1589_p0 = por %p1588_p2, %p1587_p7 }
 0x5a2   : > { %p1590_p1 = pnand %p1589_p0, %p1583_p6 }
 0x5a4   : > { %1593 = shalt.err (!%p1590_p1)
}
 0x5a5   : > { %1415 = dma.vmem_to_hbm [thread:$0]  (%p2159_p4), %s2069_s10, 128, %s1216_s16, %s1203_s21  }
 0x5a6 PF: > { %p1426_p3 = scmp.ge.s32.totalorder %s1688_s15, 2  ;;  %s1230_s26 = sand.u32 1, %s1648_s27  }
 0x5a7   : > { %p2160_p8 = scmp.ne.s32.totalorder %s2155_s8, 0  ;;  %s1231_s22 = scalar_lea.sflag [#allocation4], %s1230_s26 }
 0x5a9   : > { %p1422_p10 = pnand %p1426_p3, %p2160_p8 }
 0x5ab   : > { %1643 = dma.done.wait (!%p1422_p10), %s1231_s22, 128  }
 0x5ac   : > { %1645 = vsyncadd (!%p1422_p10), %s1231_s22, 4294967168  ;;  %s24_s15 = sadd.s32 1, %s1688_s15   ;;  %s2161_s12 = sld [smem:[#allocation8_spill]] }
 0x5ad   : > { %p21_p11 = scmp.ge.s32.totalorder %s24_s15, 10   ;;  %s2162_s10 = sld [smem:[#allocation13_spill]] }
 0x5ae   : > { %s2163_s11 = sld [smem:[#allocation9_spill]]  ;;  %s2164_s16 = sld [smem:[#allocation10_spill]] }
 0x5af   : > { %s2165_s21 = sld [smem:[#allocation11_spill]]  ;;  %s2166_s14 = sld [smem:[#allocation12_spill]] }
 0x5b0   : > { %s2167_s27 = smov %s1652_s28  ;;  %s2168_s28 = smov %s1656_s29 }
 0x5b1   : > { %s2169_s29 = smov %s1834_s13  ;;  %s2170_s30 = smov %s1664_s9 }
 0x5b2   : > { %s2171_s9 = smov %s2161_s12  ;;  %23 = sbr.rel (!%p21_p11) target bundleno = 11 (0xb), region = 116 }
 0x5b4   : > { %s2172_s12 = smov %s2164_s16 }
 0x5b5   : > { %s2173_s13 = smov %s2165_s21 }
 0x5b9   :  { %1236 = vsyncpa [#allocation3], 1 }
 0x5ba   :  { %1238 = vsyncpa [#allocation3 + $0x1], 1 }
 0x5bb   :  { %1239 = vsyncpa [#allocation4], 1 }
 0x5bc   :  { %1241 = vsyncpa [#allocation4 + $0x1], 1 }

</bundles_post_ra>
